<compile_context>
chip_gen: v6e
topology: v6e:2x2x1
jax: 0.10.0
libtpu: 0.0.40
codegen_flags: <defaults>
</compile_context>

<pallas_src>
import functools

import jax
import jax.numpy as jnp
from jax import lax
from jax.experimental import pallas as pl
from jax.experimental.pallas import tpu as pltpu


# ----------------------------------------------------------------------------
# Small helpers
# ----------------------------------------------------------------------------
def _vmem_limit_bytes():
    try:
        cap = int(pltpu.get_tpu_info().vmem_capacity_bytes)
    except Exception:
        cap = 128 << 20
    # ~3/4 of physical, capped at 100 MiB (=> ~96 MiB on v5e/v6e, ~48 MiB on v7x).
    return int(min(cap - cap // 4, 100 << 20))


def _pick_divisor(n, limit):
    """Largest divisor of n that is <= limit (at least 1)."""
    limit = max(1, int(limit))
    best = 1
    for d in range(1, n + 1):
        if n % d == 0 and d <= limit:
            best = d
    return best


def _pick_row_tile(hout, wout, n_batch, max_m=1024):
    """Row tile so th*Wout (matmul M) is large but <= max_m."""
    th = _pick_divisor(hout, max(1, max_m // max(1, wout)))
    # v7x megacore: keep >= 2 parallel grid steps when batch == 1.
    if n_batch == 1 and hout // th < 2 and hout > 1:
        th = _pick_divisor(hout, max(1, hout // 2))
    return th


def _pick_cout_tile(k_rows, cout, itemsize, max_weight_bytes=8 << 20):
    """Tile Cout (multiple of 128 dividing Cout) once the weight block gets big."""
    if k_rows * cout * itemsize <= max_weight_bytes:
        return cout
    target = max(128, max_weight_bytes // max(1, k_rows * itemsize))
    best = cout                      # fall back to no tiling if no 128-mult divisor
    for d in range(128, cout, 128):
        if cout % d == 0 and d <= target:
            best = d
    return best


def _padded_group(cin):
    """Lane-align the space-to-depth channel group when the inflation is <= 25%."""
    if cin % 128 == 0:
        return cin
    cp = ((cin + 127) // 128) * 128
    return cp if cp * 4 <= cin * 5 else cin


# ----------------------------------------------------------------------------
# Kernel 1: 3x3 / stride-2 / pad-1 conv on a space-to-depth input
# ----------------------------------------------------------------------------
# Shifted taps (kh, kw) with a row and/or column shift, in the same order as the
# rows of the second weight block: (dh, dw, space-to-depth sub-image s).
_SHIFTED_TAPS = ((-1, -1, 3), (-1, 0, 2), (-1, 0, 3), (0, -1, 1), (0, -1, 3))


def _downsample_conv_kernel(body_ref, halo_ref, w_ref, b_ref, o_ref, xp_ref,
                            *, th, wout, cg):
    """One (batch, cout-tile, output-row-tile) step.

    body_ref : (1, th, wout, 4*cg)  space-to-depth rows [t*th, (t+1)*th)
    halo_ref : (1, 1,  wout, 4*cg)  space-to-depth row  t*th - 1 (clamped to 0)
    w_ref    : (9*cg, tn)           reordered im2col weight:
                                      rows [0, 4*cg)    -> zero-shift taps (== body)
                                      rows [4*cg, 9*cg) -> the 5 shifted taps
    b_ref    : (1, tn)
    o_ref    : (1, th, wout, tn)
    xp_ref   : VMEM scratch (th+1, round8(wout+1), 4*cg): halo row + zero pads
    """
    t = pl.program_id(2)
    k4 = 4 * cg
    m = th * wout

    # Left zero-pad column. Data writes never touch it, but the scratch is
    # per-core and "first step on this core" is not portably detectable under
    # megacore sharding, so it is (cheaply) re-zeroed each step.
    xp_ref[:, 0:1, :] = jnp.zeros((th + 1, 1, k4), xp_ref.dtype)

    @pl.when(t == 0)
    def _():                                                          # top pad row
        xp_ref[0:1, 1:wout + 1, :] = jnp.zeros((1, wout, k4), xp_ref.dtype)

    @pl.when(t > 0)
    def _():                                                          # halo row
        xp_ref[0:1, 1:wout + 1, :] = halo_ref[0]

    bv = body_ref[...]                                                # (1, th, wout, 4*cg)
    xp_ref[1:th + 1, 1:wout + 1, :] = bv.reshape(th, wout, k4)

    # --- 4 zero-shift taps: the body block verbatim (no im2col copy) ----------
    acc = jnp.dot(bv.reshape(m, k4), w_ref[0:k4, :],
                  preferred_element_type=jnp.float32)

    # --- 5 shifted taps: assembled from the padded scratch, one fat K=5*cg dot -
    taps = []
    for dh, dw, s in _SHIFTED_TAPS:
        p = xp_ref[1 + dh:1 + dh + th,
                   1 + dw:1 + dw + wout,
                   s * cg:(s + 1) * cg]
        taps.append(p.reshape(m, cg))
    cols = jnp.concatenate(taps, axis=-1)                             # (m, 5*cg)
    acc += jnp.dot(cols, w_ref[k4:9 * cg, :],
                   preferred_element_type=jnp.float32)

    acc += b_ref[...].astype(jnp.float32)
    o_ref[...] = acc.reshape(1, th, wout, o_ref.shape[-1]).astype(o_ref.dtype)


def _space_to_depth(x_nchw, cg):
    """(N, C, H, W) -> (N, H/2, W/2, 4*cg); one fused XLA layout op, groups padded
    from C to cg with zeros (lane alignment)."""
    N, C, H, W = x_nchw.shape
    # TODO(synk): odd H/W (PyTorch's stride-2/pad-1 conv gives ceil(H/2)) not handled.
    assert H % 2 == 0 and W % 2 == 0, "space-to-depth path requires even H, W"
    xs = x_nchw.reshape(N, C, H // 2, 2, W // 2, 2).transpose(0, 2, 4, 3, 5, 1)
    if cg != C:
        xs = jnp.pad(xs, ((0, 0),) * 5 + ((0, cg - C),))
    return xs.reshape(N, H // 2, W // 2, 4 * cg)


def _build_weight(w_hwio, cg):
    """(3,3,C,Cout) HWIO -> (9*cg, Cout): zero-shift taps first, then shifted taps,
    with the input-channel dim zero-padded to cg."""
    C, Cout = w_hwio.shape[2], w_hwio.shape[3]
    wp = w_hwio
    if cg != C:
        wp = jnp.pad(w_hwio, ((0, 0), (0, 0), (0, cg - C), (0, 0)))
    w_zero = wp[1:3, 1:3].reshape(4 * cg, Cout)           # taps (1,1),(1,2),(2,1),(2,2)
    w_shift = jnp.concatenate(
        [wp[0, 0], wp[0, 1], wp[0, 2], wp[1, 0], wp[2, 0]], axis=0)   # (5*cg, Cout)
    return jnp.concatenate([w_zero, w_shift], axis=0)                 # (9*cg, Cout)


def downsample_conv(x_nchw, w_hwio, b, *, row_tile=None, cout_tile=None,
                    out_format="NCHW"):
    """Downsample(use_conv=True, dims=2, padding=1): 3x3 conv, stride 2, pad 1."""
    # TODO(synk): only dims=2 and padding=1 (the UNet defaults) are implemented.
    N, C, H, W = x_nchw.shape
    Hout, Wout = H // 2, W // 2
    Cout = w_hwio.shape[-1]
    dtype = x_nchw.dtype
    itemsize = jnp.dtype(dtype).itemsize

    cg = _padded_group(C)
    th = _pick_divisor(Hout, row_tile) if row_tile else _pick_row_tile(Hout, Wout, N)
    if cout_tile and Cout % cout_tile == 0:
        tn = cout_tile
    else:
        tn = _pick_cout_tile(9 * cg, Cout, itemsize)

    xs = _space_to_depth(x_nchw, cg)                      # (N, Hout, Wout, 4*cg)
    w_mat = _build_weight(w_hwio, cg).astype(dtype)       # MXU operands in act dtype
    b2 = b.reshape(1, Cout).astype(dtype)
    wp8 = ((Wout + 1 + 7) // 8) * 8                       # sublane-aligned scratch

    kernel = functools.partial(_downsample_conv_kernel, th=th, wout=Wout, cg=cg)

    out = pl.pallas_call(
        kernel,
        out_shape=jax.ShapeDtypeStruct((N, Hout, Wout, Cout), dtype),
        grid=(N, Cout // tn, Hout // th),                 # weight resident across t
        in_specs=[
            pl.BlockSpec((1, th, Wout, 4 * cg), lambda n, j, t: (n, t, 0, 0)),
            pl.BlockSpec((1, 1, Wout, 4 * cg),
                         lambda n, j, t: (n, jnp.maximum(t * th - 1, 0), 0, 0)),
            pl.BlockSpec((9 * cg, tn), lambda n, j, t: (0, j)),
            pl.BlockSpec((1, tn), lambda n, j, t: (0, j)),
        ],
        out_specs=pl.BlockSpec((1, th, Wout, tn), lambda n, j, t: (n, t, 0, j)),
        scratch_shapes=[pltpu.VMEM((th + 1, wp8, 4 * cg), dtype)],
        compiler_params=pltpu.CompilerParams(
            dimension_semantics=("parallel", "parallel", "parallel"),
            vmem_limit_bytes=_vmem_limit_bytes()),
    )(xs, xs, w_mat, b2)

    if out_format == "NHWC":
        return out                                        # skip the extra HBM pass
    return out.transpose(0, 3, 1, 2)                      # NHWC -> NCHW (module layout)


# ----------------------------------------------------------------------------
# Kernel 2: 2x2 average pool, stride 2 (use_conv=False path) — straight from NCHW
# ----------------------------------------------------------------------------
def _downsample_pool_kernel(x_ref, o_ref, *, w):
    """x_ref: (1, ct, th, 2*w) where lanes [0,w) are row 2h and [w,2w) are row 2h+1."""
    xb = x_ref[...]
    wout = w // 2
    ct, th = xb.shape[1], xb.shape[2]
    v = xb[..., 0:w] + xb[..., w:2 * w]                   # vertical 2:1 sum, (1,ct,th,w)
    # Horizontal 2:1 pooling as a tiny matmul (avoids lane-strided slices); the 0.25
    # average factor is folded into the pooling matrix.
    r = lax.broadcasted_iota(jnp.int32, (w, wout), 0)
    c = lax.broadcasted_iota(jnp.int32, (w, wout), 1)
    pool_mat = jnp.where(r // 2 == c, 0.25, 0.0).astype(v.dtype)
    out = jnp.dot(v.reshape(ct * th, w), pool_mat,
                  preferred_element_type=jnp.float32)
    o_ref[...] = out.reshape(1, ct, th, wout).astype(o_ref.dtype)


def _pick_pool_row_tile(hout, limit):
    cands = [d for d in range(1, hout + 1)
             if hout % d == 0 and (d == hout or d % 8 == 0)]
    ok = [d for d in cands if d <= limit]
    return max(ok) if ok else min(cands)


def downsample_pool(x_nchw, *, channel_tile=None, row_tile=None):
    """Downsample(use_conv=False, dims=2): 2x2 average pool, stride 2 (NCHW in/out)."""
    N, C, H, W = x_nchw.shape
    assert H % 2 == 0 and W % 2 == 0, "pool path requires even H, W"
    Hout, Wout = H // 2, W // 2
    dtype = x_nchw.dtype
    itemsize = jnp.dtype(dtype).itemsize

    target_bytes = 4 << 20
    row_bytes = 2 * W * itemsize
    ct = channel_tile or _pick_divisor(C, max(1, target_bytes // max(1, Hout * row_bytes)))
    ct = _pick_divisor(C, ct)
    thp = row_tile or _pick_pool_row_tile(Hout, max(1, target_bytes // max(1, ct * row_bytes)))
    thp = _pick_pool_row_tile(Hout, thp)

    # Free metadata reshape: (N,C,H,W) -> (N,C,H/2,2W); lanes hold the 2h/2h+1 row pair.
    xr = x_nchw.reshape(N, C, Hout, 2 * W)

    return pl.pallas_call(
        functools.partial(_downsample_pool_kernel, w=W),
        out_shape=jax.ShapeDtypeStruct((N, C, Hout, Wout), dtype),
        grid=(N, C // ct, Hout // thp),
        in_specs=[pl.BlockSpec((1, ct, thp, 2 * W), lambda n, c, t: (n, c, t, 0))],
        out_specs=pl.BlockSpec((1, ct, thp, Wout), lambda n, c, t: (n, c, t, 0)),
        compiler_params=pltpu.CompilerParams(
            dimension_semantics=("parallel", "parallel", "parallel"),
            vmem_limit_bytes=_vmem_limit_bytes()),
    )(xr)


# ----------------------------------------------------------------------------
# Module-level API (mirrors Downsample.__init__ / forward)
# ----------------------------------------------------------------------------
def make_downsample_params(key, channels, use_conv, dims=2, out_channels=None,
                           weight_scale=0.1):
    # TODO(synk): dims=1 and dims=3 variants are not implemented (only dims=2).
    assert dims == 2
    out_channels = out_channels or channels
    params = {"channels": channels, "out_channels": out_channels, "use_conv": use_conv}
    if use_conv:
        kw_, kb_ = jax.random.split(key)
        params["w"] = weight_scale * jax.random.normal(
            kw_, (3, 3, channels, out_channels), jnp.float32)        # HWIO
        params["b"] = 0.01 * jax.random.normal(kb_, (out_channels,), jnp.float32)
    else:
        assert channels == out_channels
    return params


def downsample_forward(params, x, *, out_format="NCHW"):
    assert x.shape[1] == params["channels"]
    if params["use_conv"]:
        return downsample_conv(x, params["w"], params["b"], out_format=out_format)
    return downsample_pool(x)


if __name__ == "__main__":
    key = jax.random.PRNGKey(0)
    kx, kp, kx2, kp2 = jax.random.split(key, 4)

    # ---- test 1: use_conv=True, C = Cout = 64 (lane-aligned groups) ------------
    N, C, H, W = 2, 64, 16, 16
    x = jax.random.normal(kx, (N, C, H, W), jnp.float32)
    p_conv = make_downsample_params(kp, C, use_conv=True)
    y_conv = jax.jit(downsample_conv)(x, p_conv["w"], p_conv["b"])
    jax.block_until_ready(y_conv)

    ref_conv = lax.conv_general_dilated(
        x, p_conv["w"], window_strides=(2, 2), padding=((1, 1), (1, 1)),
        dimension_numbers=("NCHW", "HWIO", "NCHW"),
    ) + p_conv["b"][None, :, None, None]
    assert y_conv.shape == (N, C, H // 2, W // 2)
    assert bool(jnp.all(jnp.isfinite(y_conv)))
    assert bool(jnp.allclose(y_conv, ref_conv, atol=2e-2, rtol=2e-2)), \
        float(jnp.max(jnp.abs(y_conv - ref_conv)))

    # ---- test 2: use_conv=False, 2x2 average pool (NCHW in/out, no transposes) -
    y_pool = jax.jit(downsample_pool)(x)
    jax.block_until_ready(y_pool)
    ref_pool = x.reshape(N, C, H // 2, 2, W // 2, 2).mean(axis=(3, 5))
    assert y_pool.shape == (N, C, H // 2, W // 2)
    assert bool(jnp.allclose(y_pool, ref_pool, atol=1e-5, rtol=1e-5))

    # ---- test 3: use_conv=True, C = Cout = 320 (lane-pad 320->384, halo, N=1) ---
    N2, C2, H2, W2 = 1, 320, 8, 8
    x2 = jax.random.normal(kx2, (N2, C2, H2, W2), jnp.float32)
    p2 = make_downsample_params(kp2, C2, use_conv=True, weight_scale=0.05)
    y2 = jax.jit(downsample_conv)(x2, p2["w"], p2["b"])
    jax.block_until_ready(y2)
    ref2 = lax.conv_general_dilated(
        x2, p2["w"], window_strides=(2, 2), padding=((1, 1), (1, 1)),
        dimension_numbers=("NCHW", "HWIO", "NCHW"),
    ) + p2["b"][None, :, None, None]
    assert y2.shape == (N2, C2, H2 // 2, W2 // 2)
    assert bool(jnp.allclose(y2, ref2, atol=5e-2, rtol=5e-2)), \
        float(jnp.max(jnp.abs(y2 - ref2)))

    print("KERNEL_OK")
</pallas_src>

<mosaic_0001>
module attributes {stable_mosaic.version = 11 : i64} {
  func.func @_downsample_conv_kernel(%arg0: i32, %arg1: i32, %arg2: i32, %arg3: memref<1x8x8x256xf32, #tpu.memory_space<vmem>>, %arg4: memref<1x1x8x256xf32, #tpu.memory_space<vmem>>, %arg5: memref<576x64xf32, #tpu.memory_space<vmem>>, %arg6: memref<1x64xf32, #tpu.memory_space<vmem>>, %arg7: memref<1x8x8x64xf32, #tpu.memory_space<vmem>>, %arg8: memref<9x16x256xf32, #tpu.memory_space<vmem>>) attributes {dimension_semantics = [#tpu.dimension_semantics<parallel>, #tpu.dimension_semantics<parallel>, #tpu.dimension_semantics<parallel>], iteration_bounds = array<i64: 2, 1, 1>, scalar_prefetch = 0 : i64, scratch_operands = 1 : i64, tpu.core_type = #tpu.core_type<tc>, window_params = [{transform_indices = @transform_0, window_bounds = array<i64: 1, 8, 8, 256>}, {transform_indices = @transform_1, window_bounds = array<i64: 1, 1, 8, 256>}, {transform_indices = @transform_2, window_bounds = array<i64: 576, 64>}, {transform_indices = @transform_3, window_bounds = array<i64: 1, 64>}, {transform_indices = @transform_4, window_bounds = array<i64: 1, 8, 8, 64>}]} {
    %cst = arith.constant 0.000000e+00 : f32
    %0 = vector.broadcast %cst : f32 to vector<9x1x256xf32>
    %c0 = arith.constant 0 : index
    %c0_0 = arith.constant 0 : index
    %c0_1 = arith.constant 0 : index
    %1 = vector.load %arg8[%c0, %c0_0, %c0_1] : memref<9x16x256xf32, #tpu.memory_space<vmem>>, vector<9x1x256xf32>
    tpu.vector_store %arg8[%c0, %c0_0, %c0_1], %0 {strides = array<i32>} : memref<9x16x256xf32, #tpu.memory_space<vmem>>, vector<9x1x256xf32>,
    %c0_i32 = arith.constant 0 : i32
    %2 = arith.cmpi eq, %arg2, %c0_i32 : i32
    %3 = arith.extui %2 : i1 to i32
    %c0_i32_2 = arith.constant 0 : i32
    %4 = arith.cmpi ne, %3, %c0_i32_2 : i32
    scf.if %4 {
      %cst_34 = arith.constant 0.000000e+00 : f32
      %33 = vector.broadcast %cst_34 : f32 to vector<1x8x256xf32>
      %c0_35 = arith.constant 0 : index
      %c1_36 = arith.constant 1 : index
      %c0_37 = arith.constant 0 : index
      %34 = vector.load %arg8[%c0_35, %c1_36, %c0_37] : memref<9x16x256xf32, #tpu.memory_space<vmem>>, vector<1x8x256xf32>
      tpu.vector_store %arg8[%c0_35, %c1_36, %c0_37], %33 {strides = array<i32>} : memref<9x16x256xf32, #tpu.memory_space<vmem>>, vector<1x8x256xf32>,
    } else {
    }
    %c0_i32_3 = arith.constant 0 : i32
    %5 = arith.cmpi sgt, %arg2, %c0_i32_3 : i32
    %6 = arith.extui %5 : i1 to i32
    %c0_i32_4 = arith.constant 0 : i32
    %7 = arith.cmpi ne, %6, %c0_i32_4 : i32
    scf.if %7 {
      %c0_34 = arith.constant 0 : index
      %c0_35 = arith.constant 0 : index
      %c0_36 = arith.constant 0 : index
      %c0_37 = arith.constant 0 : index
      %33 = vector.load %arg4[%c0_34, %c0_35, %c0_36, %c0_37] : memref<1x1x8x256xf32, #tpu.memory_space<vmem>>, vector<1x1x8x256xf32>
      %34 = vector.shape_cast %33 : vector<1x1x8x256xf32> to vector<1x8x256xf32>
      %c0_38 = arith.constant 0 : index
      %c1_39 = arith.constant 1 : index
      %c0_40 = arith.constant 0 : index
      %35 = vector.load %arg8[%c0_38, %c1_39, %c0_40] : memref<9x16x256xf32, #tpu.memory_space<vmem>>, vector<1x8x256xf32>
      tpu.vector_store %arg8[%c0_38, %c1_39, %c0_40], %34 {strides = array<i32>} : memref<9x16x256xf32, #tpu.memory_space<vmem>>, vector<1x8x256xf32>,
    } else {
    }
    %c0_5 = arith.constant 0 : index
    %c0_6 = arith.constant 0 : index
    %c0_7 = arith.constant 0 : index
    %c0_8 = arith.constant 0 : index
    %8 = vector.load %arg3[%c0_5, %c0_6, %c0_7, %c0_8] : memref<1x8x8x256xf32, #tpu.memory_space<vmem>>, vector<1x8x8x256xf32>
    %9 = vector.shape_cast %8 : vector<1x8x8x256xf32> to vector<8x8x256xf32>
    %c1 = arith.constant 1 : index
    %c1_9 = arith.constant 1 : index
    %c0_10 = arith.constant 0 : index
    %10 = vector.load %arg8[%c1, %c1_9, %c0_10] : memref<9x16x256xf32, #tpu.memory_space<vmem>>, vector<8x8x256xf32>
    tpu.vector_store %arg8[%c1, %c1_9, %c0_10], %9 {strides = array<i32>} : memref<9x16x256xf32, #tpu.memory_space<vmem>>, vector<8x8x256xf32>,
    %11 = vector.shape_cast %8 : vector<1x8x8x256xf32> to vector<64x256xf32>
    %c0_11 = arith.constant 0 : index
    %c0_12 = arith.constant 0 : index
    %12 = vector.load %arg5[%c0_11, %c0_12] : memref<576x64xf32, #tpu.memory_space<vmem>>, vector<256x64xf32>
    %cst_13 = arith.constant dense<0.000000e+00> : vector<64x64xf32>
    %13 = tpu.matmul %11, %12, %cst_13 {dimension_numbers = #tpu.dot_dimension_numbers<[1], [0], [0], [1], [0, 0, 1, 1], [], []>} : vector<64x256xf32>, vector<256x64xf32>, vector<64x64xf32> -> vector<64x64xf32>
    %c0_14 = arith.constant 0 : index
    %c0_15 = arith.constant 0 : index
    %c192 = arith.constant 192 : index
    %14 = vector.load %arg8[%c0_14, %c0_15, %c192] : memref<9x16x256xf32, #tpu.memory_space<vmem>>, vector<8x8x64xf32>
    %15 = vector.shape_cast %14 : vector<8x8x64xf32> to vector<64x64xf32>
    %c0_16 = arith.constant 0 : index
    %c1_17 = arith.constant 1 : index
    %c128 = arith.constant 128 : index
    %16 = vector.load %arg8[%c0_16, %c1_17, %c128] : memref<9x16x256xf32, #tpu.memory_space<vmem>>, vector<8x8x64xf32>
    %17 = vector.shape_cast %16 : vector<8x8x64xf32> to vector<64x64xf32>
    %c0_18 = arith.constant 0 : index
    %c1_19 = arith.constant 1 : index
    %c192_20 = arith.constant 192 : index
    %18 = vector.load %arg8[%c0_18, %c1_19, %c192_20] : memref<9x16x256xf32, #tpu.memory_space<vmem>>, vector<8x8x64xf32>
    %19 = vector.shape_cast %18 : vector<8x8x64xf32> to vector<64x64xf32>
    %c1_21 = arith.constant 1 : index
    %c0_22 = arith.constant 0 : index
    %c64 = arith.constant 64 : index
    %20 = vector.load %arg8[%c1_21, %c0_22, %c64] : memref<9x16x256xf32, #tpu.memory_space<vmem>>, vector<8x8x64xf32>
    %21 = vector.shape_cast %20 : vector<8x8x64xf32> to vector<64x64xf32>
    %c1_23 = arith.constant 1 : index
    %c0_24 = arith.constant 0 : index
    %c192_25 = arith.constant 192 : index
    %22 = vector.load %arg8[%c1_23, %c0_24, %c192_25] : memref<9x16x256xf32, #tpu.memory_space<vmem>>, vector<8x8x64xf32>
    %23 = vector.shape_cast %22 : vector<8x8x64xf32> to vector<64x64xf32>
    %24 = tpu.concatenate %15, %17, %19, %21, %23 in 1 : vector<64x64xf32>, vector<64x64xf32>, vector<64x64xf32>, vector<64x64xf32>, vector<64x64xf32> -> vector<64x320xf32>
    %c256 = arith.constant 256 : index
    %c0_26 = arith.constant 0 : index
    %25 = vector.load %arg5[%c256, %c0_26] : memref<576x64xf32, #tpu.memory_space<vmem>>, vector<320x64xf32>
    %cst_27 = arith.constant dense<0.000000e+00> : vector<64x64xf32>
    %26 = tpu.matmul %24, %25, %cst_27 {dimension_numbers = #tpu.dot_dimension_numbers<[1], [0], [0], [1], [0, 0, 1, 1], [], []>} : vector<64x320xf32>, vector<320x64xf32>, vector<64x64xf32> -> vector<64x64xf32>
    %27 = arith.addf %13, %26 : vector<64x64xf32>
    %c0_28 = arith.constant 0 : index
    %c0_29 = arith.constant 0 : index
    %28 = vector.load %arg6[%c0_28, %c0_29] : memref<1x64xf32, #tpu.memory_space<vmem>>, vector<1x64xf32>
    %29 = vector.broadcast %28 : vector<1x64xf32> to vector<64x64xf32>
    %30 = arith.addf %27, %29 : vector<64x64xf32>
    %31 = vector.shape_cast %30 : vector<64x64xf32> to vector<1x8x8x64xf32>
    %c0_30 = arith.constant 0 : index
    %c0_31 = arith.constant 0 : index
    %c0_32 = arith.constant 0 : index
    %c0_33 = arith.constant 0 : index
    %32 = vector.load %arg7[%c0_30, %c0_31, %c0_32, %c0_33] : memref<1x8x8x64xf32, #tpu.memory_space<vmem>>, vector<1x8x8x64xf32>
    tpu.vector_store %arg7[%c0_30, %c0_31, %c0_32, %c0_33], %31 {strides = array<i32>} : memref<1x8x8x64xf32, #tpu.memory_space<vmem>>, vector<1x8x8x64xf32>,
    return
  }
  func.func @transform_0(%arg0: i32, %arg1: i32, %arg2: i32) -> (i32, i32, i32, i32) {
    %c0_i32 = arith.constant 0 : i32
    %c0_i32_0 = arith.constant 0 : i32
    %c0_i32_1 = arith.constant 0 : i32
    return %arg0, %arg2, %c0_i32, %c0_i32_0 : i32, i32, i32, i32
  }
  func.func @transform_1(%arg0: i32, %arg1: i32, %arg2: i32) -> (i32, i32, i32, i32) {
    %c8_i32 = arith.constant 8 : i32
    %0 = arith.muli %arg2, %c8_i32 : i32
    %c1_i32 = arith.constant 1 : i32
    %1 = arith.subi %0, %c1_i32 : i32
    %c0_i32 = arith.constant 0 : i32
    %2 = arith.maxsi %1, %c0_i32 : i32
    %c0_i32_0 = arith.constant 0 : i32
    %c0_i32_1 = arith.constant 0 : i32
    %c0_i32_2 = arith.constant 0 : i32
    return %arg0, %2, %c0_i32_0, %c0_i32_1 : i32, i32, i32, i32
  }
  func.func @transform_2(%arg0: i32, %arg1: i32, %arg2: i32) -> (i32, i32) {
    %c0_i32 = arith.constant 0 : i32
    %c0_i32_0 = arith.constant 0 : i32
    return %c0_i32, %arg1 : i32, i32
  }
  func.func @transform_3(%arg0: i32, %arg1: i32, %arg2: i32) -> (i32, i32) {
    %c0_i32 = arith.constant 0 : i32
    %c0_i32_0 = arith.constant 0 : i32
    return %c0_i32, %arg1 : i32, i32
  }
  func.func @transform_4(%arg0: i32, %arg1: i32, %arg2: i32) -> (i32, i32, i32, i32) {
    %c0_i32 = arith.constant 0 : i32
    %c0_i32_0 = arith.constant 0 : i32
    return %arg0, %arg2, %c0_i32, %arg1 : i32, i32, i32, i32
  }
}

</mosaic_0001>

<bundles_post_ra>
// kernel: downsample_conv.1
= control target key start
LH: loop header
LB: loop body
LE: loop exit
PB: predicated region body
PF: predicated region fallthrough
CT: control target
= control target key end

     0   :  { %9 = vsyncpa [#allocation4], 0  ;;  %s2180_s0 = inlined_call_operand.vmem [shape: f32[2,8,8,256], index: 0, kind: input, shape index: {}, may-alias: {0,1}]   ;;  %s2181_s1 = inlined_call_operand.vmem [shape: f32[2,8,8,256], index: 1, kind: input, shape index: {}, may-alias: {0,1}]   ;;  %s2182_s2 = inlined_call_operand.vmem [shape: f32[576,64], index: 2, kind: input, shape index: {}]   ;;  %s2183_s3 = inlined_call_operand.vmem [shape: f32[1,64], index: 3, kind: input, shape index: {}]   ;;  %s2184_s4 = inlined_call_operand.hbm [shape: f32[2,8,8,64], index: 4, kind: output, shape index: {}]  }
   0x1   :  { %11 = vsyncpa [#allocation4 + $0x1], 0  ;;  %s1662_s15 = smov 0   ;;  %s1664_s16 = smov 0  }
   0x2   :  { %s1666_s17 = smov 0   ;;  %s1668_s18 = smov 0  }
   0x3   :  { %s1670_s1 = smov 0   ;;  %s1672_s19 = smov 0  }
   0x4 LB: > { %s1238_s20 = sadd.s32 4294967295, %s1630_s19   ;;  %s1239_s21 = sadd.s32 4294967294, %s1630_s19   ;;  %s1630_s19 = sphi %s1672_s19, %s17_s19   ;;  %s1626_s1 = sphi %s1670_s1, %s2191_s1   ;;  %s1622_s18 = sphi %s1668_s18, %s2190_s18   ;;  %s1618_s17 = sphi %s1666_s17, %s2189_s17   ;;  %s1614_s16 = sphi %s1664_s16, %s2188_s16   ;;  %s1610_s15 = sphi %s1662_s15, %s2187_s15  }
   0x5   : > { %s36_s22 = sadd.s32 1, %s1626_s1  ;;  %s163_s23 = sadd.s32 1, %s1618_s17 }
   0x6   : > { %p38_p0 = scmp.ge.s32.totalorder %s36_s22, 2  ;;  %p173_p1 = scmp.ne.s32.totalorder %s1618_s17, %s1614_s16 }
   0x7   : > { %p174_p2 = scmp.eq.s32.totalorder %s1238_s20, 1  ;;  %p179_p3 = scmp.ne.s32.totalorder %s1614_s16, %s1610_s15 }
   0x8   : > { %s2193_s22 = smov (%p38_p0, %s36_s22), 0  ;;  %p180_p5 = scmp.eq.s32.totalorder %s1239_s21, 1 }
   0x9   : > { %p1702_p4 = por %p174_p2, %p173_p1  ;;  %s156_s25 = ssub.s32 %s1626_s1, %s2193_s22 }
   0xa   : > { %p1244_p6 = scmp.ge.s32.totalorder %s1630_s19, 1  ;;  %p161_p7 = scmp.eq.s32.totalorder %s156_s25, 0 }
   0xb   : > { %p1709_p8 = por %p180_p5, %p179_p3  ;;  %p245_p9 = scmp.lt.s32.totalorder %s1630_s19, 3 }
   0xc   : > { %s1715_s27 = scalar_select %p161_p7, %s1618_s17, %s163_s23  }
   0xd   : > { %p246_p10 = pnand %p1244_p6, %p245_p9 }
   0xe   : > { %p297_p11 = scmp.lt.s32.totalorder (!%p246_p10), %s1622_s18, 1  ;;  %s1633_s12 = smov (!%p246_p10), 64  }
   0xf   : > { %249 = sbr.rel (%p246_p10) target bundleno = 429 (0x1ad), region = 36  ;;  %s293_s5 = sand.u32 (!%p246_p10), 1, %s1614_s16  }
  0x10   : > { %s1245_s6 = sshll.u32 (!%p246_p10), %s293_s5, 6 }
  0x11   : > { %s2097_s9 = scalar_lea.vmem (!%p246_p10), [#allocation3], %s1245_s6 }
  0x14   : > { %v332_v0 = vlaneseq  ;;  %v724_v1 = vld [vmem:[%s2182_s2 + $0x1f8] sm:$0xff]  ;;  %v1632_v3 = vmov 0.0   ;;  %v723_v4 = vld [vmem:[%s2182_s2 + $0x1f0] sm:$0xff]  ;;  %s298_s10 = scalar_select %p297_p11, %s1622_s18, 1  ;;  %v722_v6 = vld [vmem:[%s2182_s2 + $0x1e8] sm:$0xff]  ;;  %vm555_vm1 = vcmask 1046528  }
  0x15   : > { %v708_v2 = vld [vmem:[%s2182_s2 + $0x178] sm:$0xff]  ;;  %367 = vst [vmem:[#allocation2 + $0x8] sm:$0xfe] %v1632_v3  ;;  %369 = vst [vmem:[#allocation2 + $0x18] sm:$0x1] %v1632_v3  ;;  %1267 = vmatprep.subr.mxu0 %v724_v1  ;;  %v707_v5 = vld [vmem:[%s2182_s2 + $0x170] sm:$0xff] }
  0x16   : > { %vm334_vm0 = vcmp.lt.s32.totalorder %v332_v0, 256  ;;  %1268 = vmatpush3.msra.mxu0 %v708_v2  ;;  %v706_v7 = vld [vmem:[%s2182_s2 + $0x168] sm:$0xff]  ;;  %s1264_s20 = sshll.u32 %s298_s10, 7  ;;  %v721_v8 = vld [vmem:[%s2182_s2 + $0x1e0] sm:$0xff]  ;;  %v720_v10 = vld [vmem:[%s2182_s2 + $0x1d8] sm:$0xff]  ;;  %vm676_vm2 = vcmask 523264  }
  0x17   : > { %336 = vst.msk [vmem:[#allocation2] ss:$8 sm:$0x3] %vm334_vm0, %v1632_v3  ;;  %339 = vst.msk [vmem:[#allocation2 + $0x20] ss:$8 sm:$0x3] %vm334_vm0, %v1632_v3  ;;  %1269 = vmatprep.subr.mxu0 %v723_v4  ;;  %s1743_s29 = scalar_lea.vmem %s2180_s0, %s1264_s20 }
  0x18   : > { %342 = vst.msk [vmem:[#allocation2 + $0x40] ss:$8 sm:$0x3] %vm334_vm0, %v1632_v3  ;;  %345 = vst.msk [vmem:[#allocation2 + $0x60] ss:$8 sm:$0x3] %vm334_vm0, %v1632_v3  ;;  %1270 = vmatpush3.msra.mxu0 %v707_v5 }
  0x19   : > { %348 = vst.msk [vmem:[#allocation2 + $0x80] ss:$8 sm:$0x3] %vm334_vm0, %v1632_v3  ;;  %351 = vst.msk [vmem:[#allocation2 + $0xa0] ss:$8 sm:$0x3] %vm334_vm0, %v1632_v3  ;;  %1271 = vmatprep.subr.mxu0 %v722_v6 }
  0x1a   : > { %354 = vst.msk [vmem:[#allocation2 + $0xc0] ss:$8 sm:$0x3] %vm334_vm0, %v1632_v3  ;;  %357 = vst.msk [vmem:[#allocation2 + $0xe0] ss:$8 sm:$0x3] %vm334_vm0, %v1632_v3  ;;  %1272 = vmatpush3.msra.mxu0 %v706_v7 }
  0x1b   : > { %360 = vst.msk [vmem:[#allocation2 + $0x100] ss:$8 sm:$0x3] %vm334_vm0, %v1632_v3  ;;  %v705_v9 = vld [vmem:[%s2182_s2 + $0x160] sm:$0xff]  ;;  %v704_v11 = vld [vmem:[%s2182_s2 + $0x158] sm:$0xff]  ;;  %v1755_v12 = vld [vmem:[%s1743_s29 + $0x8] sm:$0xff]  ;;  %1273 = vmatprep.subr.mxu0 %v721_v8 }
  0x1c   : > { %v1758_v13 = vld [vmem:[%s1743_s29 + $0x38] sm:$0xff]  ;;  %v719_v15 = vld [vmem:[%s2182_s2 + $0x1d0] sm:$0xff]  ;;  %v419_v16 = vrot.slane %v1755_v12, 7  ;;  %v1770_v19 = vld [vmem:[%s1743_s29 + $0x28] sm:$0xff]  ;;  %1274 = vmatpush3.msra.mxu0 %v705_v9  ;;  %s1266_s10 = sshll.u32 %s1622_s18, 10  ;;  %s2135_s18 = scalar_lea.sflag [#allocation4], %s293_s5 }
  0x1d   : > { %v1761_v14 = vld [vmem:[%s1743_s29 + $0x18] sm:$0xff]  ;;  %v425_v17 = vrot.slane %v1758_v13, 7  ;;  %v1776_v21 = vld [vmem:[%s1743_s29 + $0x48] sm:$0xff]  ;;  %v423_v24 = vrot.slane %v1770_v19, 7  ;;  %1275 = vmatprep.subr.mxu0 %v720_v10  ;;  %v703_v31 = vld [vmem:[%s2182_s2 + $0x150] sm:$0xff]  ;;  %s2126_s13 = scalar_lea.hbm %s2184_s4, %s1266_s10  ;;  %s1634_s20 = smov [#allocation3]  }
  0x1e   : > { %v421_v18 = vrot.slane %v1761_v14, 7  ;;  %v1773_v20 = vld [vmem:[%s1743_s29 + $0x58] sm:$0xff]  ;;  %v523_v22 = vld [vmem:[#allocation2 + $0x8] sm:$0xfe]  ;;  %452 = vst [vmem:[#allocation2 + $0x28] sm:$0xfe] %v419_v16  ;;  %1276 = vmatpush3.msra.mxu0 %v704_v11 }
  0x1f   : > { %v524_v23 = vld [vmem:[#allocation2 + $0x18] sm:$0x1]  ;;  %v429_v25 = vrot.slane %v1773_v20, 7  ;;  %v556_v26 = vrot.slane %v523_v22, 1  ;;  %454 = vst [vmem:[#allocation2 + $0x38] sm:$0x1] %v419_v16  ;;  %1277 = vmatprep.subr.mxu0 %v719_v15 }
  0x20   : > { %v557_v27 = vrot.slane %v524_v23, 1  ;;  %464 = vst [vmem:[#allocation2 + $0x88] sm:$0xfe] %v425_v17  ;;  %466 = vst [vmem:[#allocation2 + $0x98] sm:$0x1] %v425_v17  ;;  %v427_v28 = vrot.slane %v1776_v21, 7  ;;  %1278 = vmatpush3.msra.mxu0 %v703_v31 }
  0x21   : > { %456 = vst [vmem:[#allocation2 + $0x48] sm:$0xfe] %v421_v18  ;;  %458 = vst [vmem:[#allocation2 + $0x58] sm:$0x1] %v421_v18  ;;  %v1782_v29 = vld [vmem:[%s1743_s29 + $0x68] sm:$0xff]  ;;  %v1785_v30 = vld [vmem:[%s1743_s29 + $0x78] sm:$0xff] }
  0x22   : > { %v515_v32 = vld [vmem:[#allocation2 + $0x8] sm:$0xff]  ;;  %460 = vst [vmem:[#allocation2 + $0x68] sm:$0xfe] %v423_v24  ;;  %462 = vst [vmem:[#allocation2 + $0x78] sm:$0x1] %v423_v24  ;;  %v431_v33 = vrot.slane %v1782_v29, 7  ;;  %v558_v37 = vsel %vm555_vm1, %v556_v26, %v557_v27 }
  0x23   : > { %472 = vst [vmem:[#allocation2 + $0xc8] sm:$0xfe] %v429_v25  ;;  %474 = vst [vmem:[#allocation2 + $0xd8] sm:$0x1] %v429_v25  ;;  %v433_v34 = vrot.slane %v1785_v30, 7  ;;  %v718_v35 = vld [vmem:[%s2182_s2 + $0x1c8] sm:$0xff]  ;;  %v1514_v40 = vpack.i.bf16 %v515_v32, %v558_v37 }
  0x24   : > { %v732_v36 = vld [vmem:[%s2182_s2 + $0x238] sm:$0xff]  ;;  %468 = vst [vmem:[#allocation2 + $0xa8] sm:$0xfe] %v427_v28  ;;  %470 = vst [vmem:[#allocation2 + $0xb8] sm:$0x1] %v427_v28  ;;  %v702_v38 = vld [vmem:[%s2182_s2 + $0x148] sm:$0xff]  ;;  %1279 = vmatprep.subr.mxu0 %v718_v35 }
  0x25   : > { %1395 = vmatprep.subr.mxu1 %v732_v36  ;;  %v731_v39 = vld [vmem:[%s2182_s2 + $0x230] sm:$0xff]  ;;  %476 = vst [vmem:[#allocation2 + $0xe8] sm:$0xfe] %v431_v33  ;;  %478 = vst [vmem:[#allocation2 + $0xf8] sm:$0x1] %v431_v33  ;;  %v717_v41 = vld [vmem:[%s2182_s2 + $0x1c0] sm:$0xff]  ;;  %1515 = vrot.lane.b32.xlu1 %v1514_v40, %s1633_s12 }
  0x26   : > { %480 = vst [vmem:[#allocation2 + $0x108] sm:$0xfe] %v433_v34  ;;  %1396 = vmatpush3.msra.mxu1 %v732_v36  ;;  %v701_v42 = vld [vmem:[%s2182_s2 + $0x140] sm:$0xff]  ;;  %v730_v43 = vld [vmem:[%s2182_s2 + $0x228] sm:$0xff]  ;;  %1280 = vmatpush3.msra.mxu0 %v702_v38  ;;  %v716_v44 = vld [vmem:[%s2182_s2 + $0x1b8] sm:$0xff]  ;;  %s1558_s21 = sshll.u32 %s1634_s20, 4  ;;  %s1559_s21 = int_to_ptr.vmem [resolvable:$false] %s1558_s21 }
  0x27   : > { %1397 = vmatprep.subr.mxu1 %v731_v39  ;;  %1281 = vmatprep.subr.mxu0 %v717_v41  ;;  %v700_v45 = vld [vmem:[%s2182_s2 + $0x138] sm:$0xff]  ;;  %v715_v46 = vld [vmem:[%s2182_s2 + $0x1b0] sm:$0xff]  ;;  %v588_v47 = vld [vmem:[#allocation2 + $0x28] sm:$0xff]  ;;  %s1560_s23 = scalar_lea.vmem %s1559_s21, 2048 }
  0x28   : > { %1398 = vmatpush3.msra.mxu1 %v731_v39  ;;  %v1824_v48 = vld [vmem:[#allocation2 + $0x88] sm:$0xff]  ;;  %1282 = vmatpush3.msra.mxu0 %v701_v42  ;;  %v699_v49 = vld [vmem:[%s2182_s2 + $0x130] sm:$0xff]  ;;  %v526_v51 = vld [vmem:[#allocation2 + $0x38] sm:$0x1] }
  0x29   : > { %1399 = vmatprep.subr.mxu1 %v730_v43  ;;  %660 = vrot.lane.b32.xlu0 %v588_v47, %s1633_s12  ;;  %v525_v50 = vld [vmem:[#allocation2 + $0x28] sm:$0xfe]  ;;  %v729_v52 = vld [vmem:[%s2182_s2 + $0x220] sm:$0xff]  ;;  %v560_v55 = vrot.slane %v526_v51, 1  ;;  %v528_v59 = vld [vmem:[#allocation2 + $0x58] sm:$0x1] }
  0x2a   : > { %1283 = vmatprep.subr.mxu0 %v716_v44  ;;  %666 = vrot.lane.b32.xlu1 %v1824_v48, %s1633_s12  ;;  %v1835_v53 = vld [vmem:[#allocation2 + $0x48] sm:$0xff]  ;;  %v559_v54 = vrot.slane %v525_v50, 1  ;;  %v530_v62 = vld [vmem:[#allocation2 + $0x78] sm:$0x1]  ;;  %v713_v0 = vld [vmem:[%s2182_s2 + $0x1a0] sm:$0xff]  ;;  %v563_v7 = vrot.slane %v528_v59, 1 }
  0x2b   : > { %1284 = vmatpush3.msra.mxu0 %v700_v45  ;;  %v714_v56 = vld [vmem:[%s2182_s2 + $0x1a8] sm:$0xff]  ;;  %1400 = vmatpush3.msra.mxu1 %v730_v43  ;;  %v566_v2 = vrot.slane %v530_v62, 1  ;;  %v697_v3 = vld [vmem:[%s2182_s2 + $0x120] sm:$0xff]  ;;  %v728_v4 = vld [vmem:[%s2182_s2 + $0x218] sm:$0xff] }
  0x2c   : > { %v698_v57 = vld [vmem:[%s2182_s2 + $0x128] sm:$0xff]  ;;  %1285 = vmatprep.subr.mxu0 %v715_v46  ;;  %v561_v61 = vsel %vm555_vm1, %v559_v54, %v560_v55  ;;  %1401 = vmatprep.subr.mxu1 %v729_v52  ;;  %v712_v8 = vld [vmem:[%s2182_s2 + $0x198] sm:$0xff]  ;;  %v711_v10 = vld [vmem:[%s2182_s2 + $0x190] sm:$0xff] }
  0x2d   : > { %v527_v58 = vld [vmem:[#allocation2 + $0x48] sm:$0xfe]  ;;  %1286 = vmatpush3.msra.mxu0 %v699_v49  ;;  %662 = vrot.lane.b32.xlu0 %v1835_v53, %s1633_s12  ;;  %v1519_v1 = vpack.i.bf16 %v588_v47, %v561_v61  ;;  %v696_v9 = vld [vmem:[%s2182_s2 + $0x118] sm:$0xff]  ;;  %v695_v16 = vld [vmem:[%s2182_s2 + $0x110] sm:$0xff] }
  0x2e   : > { %v529_v60 = vld [vmem:[#allocation2 + $0x68] sm:$0xfe]  ;;  %1287 = vmatprep.subr.mxu0 %v714_v56  ;;  %v562_v6 = vrot.slane %v527_v58, 1  ;;  %1402 = vmatpush3.msra.mxu1 %v729_v52  ;;  %v727_v17 = vld [vmem:[%s2182_s2 + $0x210] sm:$0xff]  ;;  %v534_v22 = vld [vmem:[#allocation2 + $0xb8] sm:$0x1] }
  0x2f   : > { %v565_v63 = vrot.slane %v529_v60, 1  ;;  %v590_v5 = vld [vmem:[#allocation2 + $0x68] sm:$0xff]  ;;  %1288 = vmatpush3.msra.mxu0 %v698_v57  ;;  %1520 = vrot.lane.b32.xlu1 %v1519_v1, %s1633_s12  ;;  %v1876_v23 = vld [vmem:[%s1743_s29] sm:$0xff]  ;;  %v532_v32 = vld [vmem:[#allocation2 + $0x98] sm:$0x1]  ;;  %v572_v35 = vrot.slane %v534_v22, 1 }
  0x30   : > { %1289 = vmatprep.subr.mxu0 %v713_v0  ;;  %v1865_v11 = vld [vmem:[#allocation2 + $0xa8] sm:$0xff]  ;;  %1403 = vmatprep.subr.mxu1 %v728_v4  ;;  %v564_v25 = vsel %vm555_vm1, %v562_v6, %v563_v7  ;;  %v418_v27 = vrot.slane %v1876_v23, 7  ;;  %v1894_v37 = vld [vmem:[%s1743_s29 + $0x10] sm:$0xff]  ;;  %v538_v40 = vld [vmem:[#allocation2 + $0xf8] sm:$0x1]  ;;  %v569_v44 = vrot.slane %v532_v32, 1 }
  0x31   : > { %v567_v15 = vsel %vm555_vm1, %v565_v63, %v566_v2  ;;  %1290 = vmatpush3.msra.mxu0 %v697_v3  ;;  %664 = vrot.lane.b32.xlu0 %v590_v5, %s1633_s12  ;;  %v533_v18 = vld [vmem:[#allocation2 + $0xa8] sm:$0xfe]  ;;  %v1524_v38 = vpack.i.bf16 %v1835_v53, %v564_v25  ;;  %v709_v41 = vld [vmem:[%s2182_s2 + $0x180] sm:$0xff]  ;;  %v420_v42 = vrot.slane %v1894_v37, 7  ;;  %v536_v47 = vld [vmem:[#allocation2 + $0xd8] sm:$0x1] }
  0x32   : > { %1291 = vmatprep.subr.mxu0 %v712_v8  ;;  %v1878_v24 = vld [vmem:[#allocation2 + $0xc8] sm:$0xff]  ;;  %1404 = vmatpush3.msra.mxu1 %v728_v4  ;;  %v1529_v28 = vpack.i.bf16 %v590_v5, %v567_v15  ;;  %v571_v34 = vrot.slane %v533_v18, 1  ;;  %451 = vst [vmem:[#allocation2 + $0x20] sm:$0xfe] %v418_v27  ;;  %v693_v45 = vld [vmem:[%s2182_s2 + $0x100] sm:$0xff]  ;;  %v578_v53 = vrot.slane %v538_v40, 1 }
  0x33   : > { %1292 = vmatpush3.msra.mxu0 %v696_v9  ;;  %v710_v26 = vld [vmem:[%s2182_s2 + $0x188] sm:$0xff]  ;;  %668 = vrot.lane.b32.xlu1 %v1865_v11, %s1633_s12  ;;  %v725_v49 = vld [vmem:[%s2182_s2 + $0x200] sm:$0xff]  ;;  %455 = vst [vmem:[#allocation2 + $0x40] sm:$0xfe] %v420_v42  ;;  %v514_v55 = vld [vmem:[%s2182_s2 + $0xf8] sm:$0xff]  ;;  %v575_v60 = vrot.slane %v536_v47, 1 }
  0x34   : > { %v531_v31 = vld [vmem:[#allocation2 + $0x88] sm:$0xfe]  ;;  %1293 = vmatprep.subr.mxu0 %v711_v10  ;;  %1405 = vmatprep.subr.mxu1 %v727_v17  ;;  %v573_v51 = vsel %vm555_vm1, %v571_v34, %v572_v35  ;;  %v1912_v54 = vld [vmem:[%s1743_s29 + $0x20] sm:$0xff]  ;;  %v1921_v61 = vld [vmem:[%s1743_s29 + $0x30] sm:$0xff] }
  0x35   : > { %v694_v33 = vld [vmem:[%s2182_s2 + $0x108] sm:$0xff]  ;;  %1294 = vmatpush3.msra.mxu0 %v695_v16  ;;  %670 = vrot.lane.b32.xlu0 %v1878_v24, %s1633_s12  ;;  %v568_v43 = vrot.slane %v531_v31, 1  ;;  %v422_v56 = vrot.slane %v1912_v54, 7  ;;  %v1539_v62 = vpack.i.bf16 %v1865_v11, %v573_v51  ;;  %v424_v63 = vrot.slane %v1921_v61, 7  ;;  %v1928_v1 = vld [vmem:[%s1743_s29 + $0x40] sm:$0xff]  ;;  %v1934_v4 = vld [vmem:[%s1743_s29 + $0x50] sm:$0xff] }
  0x36   : > { %v726_v36 = vld [vmem:[%s2182_s2 + $0x208] sm:$0xff]  ;;  %1295 = vmatprep.subr.mxu0 %v710_v26  ;;  %1406 = vmatpush3.msra.mxu1 %v727_v17  ;;  %v426_v3 = vrot.slane %v1928_v1, 7  ;;  %v428_v6 = vrot.slane %v1934_v4, 7  ;;  %v1939_v7 = vld [vmem:[%s1743_s29 + $0x60] sm:$0xff]  ;;  %v1944_v10 = vld [vmem:[%s1743_s29 + $0x70] sm:$0xff]  ;;  %s1104_s29 = sshll.u32 %s2097_s9, 4  ;;  %s2128_s29 = int_to_ptr.vmem [resolvable:$true] %s1104_s29 }
  0x37   : > { %v537_v39 = vld [vmem:[#allocation2 + $0xe8] sm:$0xfe]  ;;  %1296 = vmatpush3.msra.mxu0 %v694_v33  ;;  %1530 = vrot.lane.b32.xlu1 %v1529_v28, %s1633_s12  ;;  %v570_v58 = vsel %vm555_vm1, %v568_v43, %v569_v44  ;;  %459 = vst [vmem:[#allocation2 + $0x60] sm:$0xfe] %v422_v56  ;;  %463 = vst [vmem:[#allocation2 + $0x80] sm:$0xfe] %v424_v63  ;;  %p1561_p1 = scmp.lt.s32.totalorder %s2128_s29, %s1559_s21 }
  0x38   : > { %v535_v46 = vld [vmem:[#allocation2 + $0xc8] sm:$0xfe]  ;;  %1407 = vmatprep.subr.mxu1 %v726_v36  ;;  %v577_v52 = vrot.slane %v537_v39, 1  ;;  %1297 = vmatprep.subr.mxu0 %v709_v41  ;;  %v1534_v2 = vpack.i.bf16 %v1824_v48, %v570_v58  ;;  %467 = vst [vmem:[#allocation2 + $0xa0] sm:$0xfe] %v426_v3  ;;  %v430_v9 = vrot.slane %v1939_v7, 7 }
  0x39   : > { %v595_v50 = vld [vmem:[#allocation2 + $0x108] sm:$0xff]  ;;  %1408 = vmatpush3.msra.mxu1 %v726_v36  ;;  %1525 = vrot.lane.b32.xlu0 %v1524_v38, %s1633_s12  ;;  %v574_v59 = vrot.slane %v535_v46, 1  ;;  %471 = vst [vmem:[#allocation2 + $0xc0] sm:$0xfe] %v428_v6  ;;  %v432_v48 = vrot.slane %v1944_v10, 7  ;;  %v580_v16 = vld [vmem:[#allocation2 + $0x20] sm:$0xff] }
  0x3a   : > { %1298 = vmatpush3.msra.mxu0 %v693_v45  ;;  %v594_v57 = vld [vmem:[#allocation2 + $0xe8] sm:$0xff]  ;;  %1409 = vmatprep.subr.mxu1 %v725_v49  ;;  %v579_v0 = vsel %vm555_vm1, %v577_v52, %v578_v53  ;;  %475 = vst [vmem:[#allocation2 + $0xe0] sm:$0xfe] %v430_v9  ;;  %v513_v28 = vld [vmem:[%s2182_s2 + $0xf0] sm:$0xff]  ;;  %v581_v35 = vld [vmem:[#allocation2 + $0x40] sm:$0xff]  ;;  %s1554_s14 = scalar_lea.vmem %s2128_s29, 1024 }
  0x3b   : > { %1339 = vmatprep.subr.mxu0 %v514_v55  ;;  %674 = vrot.lane.b32.xlu1 %v595_v50, %s1633_s12  ;;  %v576_v5 = vsel %vm555_vm1, %v574_v59, %v575_v60  ;;  %v1549_v8 = vpack.i.bf16 %v594_v57, %v579_v0  ;;  %479 = vst [vmem:[#allocation2 + $0x100] sm:$0xfe] %v432_v48  ;;  %v497_v32 = vld [vmem:[%s2182_s2 + $0x70] sm:$0xff]  ;;  %v512_v33 = vld [vmem:[%s2182_s2 + $0xe8] sm:$0xff]  ;;  %v511_v40 = vld [vmem:[%s2182_s2 + $0xe0] sm:$0xff]  ;;  %p1555_p12 = scmp.ne.s32.totalorder %s2128_s29, %s1554_s14  ;;  %p1562_p2 = scmp.lt.s32.totalorder %s1560_s23, %s1554_s14 }
  0x3c   : > { %1410 = vmatpush3.msra.mxu1 %v725_v49  ;;  %v1544_v11 = vpack.i.bf16 %v1878_v24, %v576_v5  ;;  %v498_v24 = vld [vmem:[%s2182_s2 + $0x78] sm:$0xff]  ;;  %v496_v36 = vld [vmem:[%s2182_s2 + $0x68] sm:$0xff]  ;;  %v495_v44 = vld [vmem:[%s2182_s2 + $0x60] sm:$0xff] }
  0x3d   : > { %1423 = vmatprep.subr.mxu1 %v514_v55  ;;  %672 = vrot.lane.b32.xlu0 %v594_v57, %s1633_s12  ;;  %v510_v45 = vld [vmem:[%s2182_s2 + $0xd8] sm:$0xff]  ;;  %v509_v50 = vld [vmem:[%s2182_s2 + $0xd0] sm:$0xff]  ;;  %v508_v52 = vld [vmem:[%s2182_s2 + $0xc8] sm:$0xff]  ;;  %p1556_p13 = pnand %p1555_p12, %p1702_p4  ;;  %p1563_p3 = por %p1562_p2, %p1561_p1 }
  0x3e   : > { %v494_v47 = vld [vmem:[%s2182_s2 + $0x58] sm:$0xff]  ;;  %v493_v51 = vld [vmem:[%s2182_s2 + $0x50] sm:$0xff]  ;;  %v492_v55 = vld [vmem:[%s2182_s2 + $0x48] sm:$0xff] }
  0x3f   : > { %1540 = vrot.lane.b32.xlu1 %v1539_v62, %s1633_s12  ;;  %v507_v58 = vld [vmem:[%s2182_s2 + $0xc0] sm:$0xff]  ;;  %v490_v9 = vld [vmem:[%s2182_s2 + $0x38] sm:$0xff]  ;;  %p1557_p0 = pneg %p1556_p13 }
  0x40   : > { %v582_v59 = vld [vmem:[#allocation2 + $0x60] sm:$0xff] }
  0x41   : > { %1535 = vrot.lane.b32.xlu0 %v1534_v2, %s1633_s12  ;;  %v583_v60 = vld [vmem:[#allocation2 + $0x80] sm:$0xff]  ;;  %v506_v2 = vld [vmem:[%s2182_s2 + $0xb8] sm:$0xff]  ;;  %p1564_p5 = pnand %p1563_p3, %p1557_p0 }
  0x42   : > { %v491_v0 = vld [vmem:[%s2182_s2 + $0x40] sm:$0xff] }
  0x43   : > { %1550 = vrot.lane.b32.xlu1 %v1549_v8, %s1633_s12 }
  0x45   : > { %1545 = vrot.lane.b32.xlu0 %v1544_v11, %s1633_s12 }
  0x97   : > { %v1516_v15 = vpop.permute.xlu1 %1515 }
  0x98   : > { %v1518_v17 = vunpack.i.h.bf16 %v1516_v15  ;;  %v1517_v18 = vunpack.i.l.bf16 %v1516_v15  ;;  %v505_v15 = vld [vmem:[%s2182_s2 + $0xb0] sm:$0xff] }
  0x9a   : > { %v685_v25 = vsel %vm676_vm2, %v1517_v18, %v580_v16  ;;  %v677_v26 = vsel %vm676_vm2, %v1518_v17, %v1517_v18  ;;  %v489_v16 = vld [vmem:[%s2182_s2 + $0x30] sm:$0xff]  ;;  %v504_v17 = vld [vmem:[%s2182_s2 + $0xa8] sm:$0xff] }
  0x9b   : > { %v661_v22 = vpop.permute.xlu0 %660  ;;  %813 = vmatprep.mubr.f32.mxu0 %v685_v25 }
  0x9c   : > { %v667_v27 = vpop.permute.xlu1 %666  ;;  %1411 = vmatprep.mubr.msk.f32.mxu1 %vm676_vm2, %v661_v22  ;;  %814 = vmatmul.mubr.f32.vlgmr.msra.gmra.mxu0 %v677_v26  ;;  %v488_v22 = vld [vmem:[%s2182_s2 + $0x28] sm:$0xff]  ;;  %v503_v26 = vld [vmem:[%s2182_s2 + $0xa0] sm:$0xff] }
  0x9d   : > { %1340 = vmatpush3.msra.mxu0 %v498_v24 }
  0x9e   : > { %1341 = vmatprep.subr.mxu0 %v513_v28 }
  0x9f   : > { %v663_v31 = vpop.permute.xlu0 %662  ;;  %1342 = vmatpush3.msra.mxu0 %v497_v32 }
  0xa0   : > { %1412 = vmatmul.mubr.msk.f32.vlgmr.msra.gmra.mxu1 %vm676_vm2, %v663_v31  ;;  %1343 = vmatprep.subr.mxu0 %v512_v33 }
  0xa1   : > { %1439 = vmatpush3.msra.mxu1 %v498_v24  ;;  %v1521_v34 = vpop.permute.xlu1 %1520  ;;  %1344 = vmatpush3.msra.mxu0 %v496_v36  ;;  %v584_v24 = vld [vmem:[#allocation2 + $0xa0] sm:$0xff] }
  0xa2   : > { %v1523_v38 = vunpack.i.h.bf16 %v1521_v34  ;;  %v1522_v39 = vunpack.i.l.bf16 %v1521_v34  ;;  %1424 = vmatprep.subr.mxu1 %v513_v28  ;;  %1345 = vmatprep.subr.mxu0 %v511_v40 }
  0xa3   : > { %1440 = vmatpush3.msra.mxu1 %v497_v32  ;;  %v665_v41 = vpop.permute.xlu0 %664  ;;  %1346 = vmatpush3.msra.mxu0 %v495_v44  ;;  %v487_v32 = vld [vmem:[%s2182_s2 + $0x20] sm:$0xff] }
  0xa4   : > { %1425 = vmatprep.subr.mxu1 %v512_v33  ;;  %v686_v42 = vsel %vm676_vm2, %v1522_v39, %v581_v35  ;;  %v678_v43 = vsel %vm676_vm2, %v1523_v38, %v1522_v39  ;;  %1414 = vmatprep.mubr.msk.f32.mxu1 %vm676_vm2, %v665_v41  ;;  %v502_v33 = vld [vmem:[%s2182_s2 + $0x98] sm:$0xff]  ;;  %v585_v39 = vld [vmem:[#allocation2 + $0xc0] sm:$0xff]  ;;  %v501_v41 = vld [vmem:[%s2182_s2 + $0x90] sm:$0xff] }
  0xa5   : > { %818 = vmatprep.mubr.f32.mxu0 %v686_v42  ;;  %1441 = vmatpush3.msra.mxu1 %v496_v36  ;;  %v669_v46 = vpop.permute.xlu1 %668  ;;  %v486_v38 = vld [vmem:[%s2182_s2 + $0x18] sm:$0xff] }
  0xa6   : > { %819 = vmatmul.mubr.f32.gmra.mxu0 %v678_v43  ;;  %1426 = vmatprep.subr.mxu1 %v511_v40  ;;  %v485_v43 = vld [vmem:[%s2182_s2 + $0x10] sm:$0xff] }
  0xa7   : > { %1442 = vmatpush3.msra.mxu1 %v495_v44  ;;  %v671_v49 = vpop.permute.xlu0 %670  ;;  %1347 = vmatprep.subr.mxu0 %v510_v45  ;;  %v500_v44 = vld [vmem:[%s2182_s2 + $0x88] sm:$0xff] }
  0xa8   : > { %1427 = vmatprep.subr.mxu1 %v510_v45  ;;  %1415 = vmatmul.mubr.msk.f32.gmra.mxu1 %vm676_vm2, %v667_v27 }
  0xa9   : > { %1443 = vmatpush3.msra.mxu1 %v494_v47  ;;  %1417 = vmatprep.mubr.msk.f32.mxu1 %vm676_vm2, %v669_v46  ;;  %v1531_v53 = vpop.permute.xlu1 %1530 }
  0xaa   : > { %1428 = vmatprep.subr.mxu1 %v509_v50  ;;  %v1532_v56 = vunpack.i.l.bf16 %v1531_v53  ;;  %1348 = vmatpush3.msra.mxu0 %v494_v47  ;;  %v1533_v3 = vunpack.i.h.bf16 %v1531_v53  ;;  %v484_v47 = vld [vmem:[%s2182_s2 + $0x8] sm:$0xff]  ;;  %v499_v53 = vld [vmem:[%s2182_s2 + $0x80] sm:$0xff] }
  0xab   : > { %1444 = vmatpush3.msra.mxu1 %v493_v51  ;;  %v1526_v57 = vpop.permute.xlu0 %1525  ;;  %1349 = vmatprep.subr.mxu0 %v509_v50 }
  0xac   : > { %1429 = vmatprep.subr.mxu1 %v508_v52  ;;  %v1528_v62 = vunpack.i.h.bf16 %v1526_v57  ;;  %v1527_v63 = vunpack.i.l.bf16 %v1526_v57  ;;  %1418 = vmatmul.mubr.msk.f32.gmra.mxu1 %vm676_vm2, %v671_v49  ;;  %v688_v48 = vsel %vm676_vm2, %v1532_v56, %v583_v60  ;;  %v680_v18 = vsel %vm676_vm2, %v1533_v3, %v1532_v56 }
  0xad   : > { %1445 = vmatpush3.msra.mxu1 %v492_v55  ;;  %v675_v5 = vpop.permute.xlu1 %674  ;;  %1350 = vmatpush3.msra.mxu0 %v493_v51  ;;  %v586_v51 = vld [vmem:[#allocation2 + $0xe0] sm:$0xff] }
  0xae   : > { %1430 = vmatprep.subr.mxu1 %v507_v58  ;;  %v687_v6 = vsel %vm676_vm2, %v1527_v63, %v582_v59  ;;  %v679_v8 = vsel %vm676_vm2, %v1528_v62, %v1527_v63  ;;  %1351 = vmatprep.subr.mxu0 %v508_v52 }
  0xaf   : > { %1446 = vmatpush3.msra.mxu1 %v491_v0  ;;  %v673_v11 = vpop.permute.xlu0 %672  ;;  %823 = vmatprep.mubr.f32.mxu0 %v687_v6 }
  0xb0   : > { %1431 = vmatprep.subr.mxu1 %v506_v2  ;;  %824 = vmatmul.mubr.f32.gmra.mxu0 %v679_v8 }
  0xb1   : > { %1447 = vmatpush3.msra.mxu1 %v490_v9  ;;  %828 = vmatprep.mubr.f32.mxu0 %v688_v48  ;;  %v1541_v27 = vpop.permute.xlu1 %1540 }
  0xb2   : > { %1432 = vmatprep.subr.mxu1 %v505_v15  ;;  %1352 = vmatpush3.msra.mxu0 %v492_v55  ;;  %v1542_v34 = vunpack.i.l.bf16 %v1541_v27  ;;  %v1543_v40 = vunpack.i.h.bf16 %v1541_v27  ;;  %v483_v55 = vld [vmem:[%s2182_s2] sm:$0xff] }
  0xb3   : > { %1448 = vmatpush3.msra.mxu1 %v489_v16  ;;  %v1536_v25 = vpop.permute.xlu0 %1535  ;;  %1353 = vmatprep.subr.mxu0 %v507_v58  ;;  %v587_v58 = vld [vmem:[#allocation2 + $0x100] sm:$0xff] }
  0xb4   : > { %1433 = vmatprep.subr.mxu1 %v504_v17  ;;  %v1538_v28 = vunpack.i.h.bf16 %v1536_v25  ;;  %v1537_v31 = vunpack.i.l.bf16 %v1536_v25  ;;  %829 = vmatmul.mubr.f32.gmra.mxu0 %v680_v18  ;;  %v690_v45 = vsel %vm676_vm2, %v1542_v34, %v585_v39  ;;  %v682_v49 = vsel %vm676_vm2, %v1543_v40, %v1542_v34  ;;  %v2094_v18 = vld [vmem:[%s2183_s3] ss:$0 sm:$0xff] }
  0xb5   : > { %1449 = vmatpush3.msra.mxu1 %v488_v22  ;;  %1420 = vmatprep.mubr.msk.f32.mxu1 %vm676_vm2, %v673_v11  ;;  %v1551_v50 = vpop.permute.xlu1 %1550 }
  0xb6   : > { %1434 = vmatprep.subr.mxu1 %v503_v26  ;;  %v689_v35 = vsel %vm676_vm2, %v1537_v31, %v584_v24  ;;  %v681_v36 = vsel %vm676_vm2, %v1538_v28, %v1537_v31  ;;  %1354 = vmatpush3.msra.mxu0 %v491_v0  ;;  %v1552_v56 = vunpack.i.l.bf16 %v1551_v50  ;;  %v1553_v59 = vunpack.i.h.bf16 %v1551_v50 }
  0xb7   : > { %1450 = vmatpush3.msra.mxu1 %v487_v32  ;;  %833 = vmatprep.mubr.f32.mxu0 %v689_v35  ;;  %v1546_v42 = vpop.permute.xlu0 %1545 }
  0xb8   : > { %1435 = vmatprep.subr.mxu1 %v502_v33  ;;  %834 = vmatmul.mubr.f32.gmra.mxu0 %v681_v36  ;;  %v1547_v46 = vunpack.i.l.bf16 %v1546_v42  ;;  %v1548_v52 = vunpack.i.h.bf16 %v1546_v42  ;;  %v692_v62 = vsel %vm676_vm2, %v1552_v56, %v587_v58  ;;  %v684_v63 = vsel %vm676_vm2, %v1553_v59, %v1552_v56 }
  0xb9   : > { %1355 = vmatprep.subr.mxu0 %v506_v2  ;;  %1451 = vmatpush3.msra.mxu1 %v486_v38 }
  0xba   : > { %1356 = vmatpush3.msra.mxu0 %v490_v9  ;;  %1421 = vmatmul.mubr.msk.f32.gmra.mxu1 %vm676_vm2, %v675_v5  ;;  %v691_v57 = vsel %vm676_vm2, %v1547_v46, %v586_v51  ;;  %v683_v60 = vsel %vm676_vm2, %v1548_v52, %v1547_v46 }
  0xbb   : > { %1436 = vmatprep.subr.mxu1 %v501_v41  ;;  %1357 = vmatprep.subr.mxu0 %v505_v15 }
  0xbc   : > { %1452 = vmatpush3.msra.mxu1 %v485_v43  ;;  %838 = vmatprep.mubr.f32.mxu0 %v690_v45 }
  0xbd   : > { %1437 = vmatprep.subr.mxu1 %v500_v44  ;;  %1358 = vmatpush3.msra.mxu0 %v489_v16 }
  0xbe   : > { %1453 = vmatpush3.msra.mxu1 %v484_v47  ;;  %839 = vmatmul.mubr.f32.gmra.mxu0 %v682_v49 }
  0xbf   : > { %1359 = vmatprep.subr.mxu0 %v504_v17  ;;  %1438 = vmatprep.subr.mxu1 %v499_v53 }
  0xc0   : > { %1360 = vmatpush3.msra.mxu0 %v488_v22  ;;  %1454 = vmatpush3.msra.mxu1 %v483_v55 }
  0xc1   : > { %1361 = vmatprep.subr.mxu0 %v503_v26  ;;  %1033 = vmatprep.mubr.f32.mxu1 %v1770_v19 }
  0xc2   : > { %843 = vmatprep.mubr.f32.mxu0 %v691_v57  ;;  %1034 = vmatmul.mubr.f32.vlgmr.msra.gmra.mxu1 %v1912_v54 }
  0xc3   : > { %1362 = vmatpush3.msra.mxu0 %v487_v32  ;;  %1038 = vmatprep.mubr.f32.mxu1 %v1758_v13 }
  0xc4   : > { %844 = vmatmul.mubr.f32.gmra.mxu0 %v683_v60  ;;  %1363 = vmatprep.subr.mxu0 %v502_v33 }
  0xc5   : > { %1364 = vmatpush3.msra.mxu0 %v486_v38  ;;  %848 = vmatprep.mubr.f32.mxu0 %v692_v62 }
  0xc6   : > { %1365 = vmatprep.subr.mxu0 %v501_v41  ;;  %1039 = vmatmul.mubr.f32.gmra.mxu1 %v1921_v61 }
  0xc7   : > { %1366 = vmatpush3.msra.mxu0 %v485_v43  ;;  %1043 = vmatprep.mubr.f32.mxu1 %v1776_v21 }
  0xc8   : > { %849 = vmatmul.mubr.f32.gmra.mxu0 %v684_v63  ;;  %1367 = vmatprep.subr.mxu0 %v500_v44 }
  0xc9   : > { %1368 = vmatpush3.msra.mxu0 %v484_v47  ;;  %1023 = vmatprep.mubr.f32.mxu0 %v1755_v12 }
  0xca   : > { %1369 = vmatprep.subr.mxu0 %v499_v53  ;;  %1044 = vmatmul.mubr.f32.gmra.mxu1 %v1928_v1 }
  0xcb   : > { %1370 = vmatpush3.msra.mxu0 %v483_v55  ;;  %1048 = vmatprep.mubr.f32.mxu1 %v1773_v20 }
  0xcc   : > { %1024 = vmatmul.mubr.f32.vlgmr.msra.gmra.mxu0 %v1876_v23 }
  0xcd   : > { %1028 = vmatprep.mubr.f32.mxu0 %v1761_v14 }
  0xce   : > { %1049 = vmatmul.mubr.f32.gmra.mxu1 %v1934_v4 }
  0xcf   : > { %1053 = vmatprep.mubr.f32.mxu1 %v1782_v29 }
  0xd0   : > { %1029 = vmatmul.mubr.f32.gmra.mxu0 %v1894_v37 }
  0xd2   : > { %1054 = vmatmul.mubr.f32.gmra.mxu1 %v1939_v7 }
  0xd3   : > { %1058 = vmatprep.mubr.f32.mxu1 %v1785_v30 }
  0xd6   : > { %1059 = vmatmul.mubr.f32.gmra.mxu1 %v1944_v10 }
 0x15c   : > { %v1299_v12 = vpop.f32.mrf.mxu0 }
 0x15e   : > { %v1300_v13 = vpop.f32.mrf.mxu0 }
 0x15f   : > { %v1301_v34 = vadd.f32 %v1300_v13, %v1299_v12 }
 0x160   : > { %v2084_v19 = vpop.f32.mrf.mxu1 }
 0x162   : > { %v920_v20 = vpop.f32.mrf.mxu1 }
 0x163   : > { %v921_v45 = vadd.f32 %v1301_v34, %v920_v20 }
 0x166   : > { %v1302_v21 = vpop.f32.mrf.mxu0 }
 0x168   : > { %v1303_v23 = vpop.f32.mrf.mxu0  ;;  %v1416_v14 = vpop.f32.mrf.mxu1 }
 0x169   : > { %v1304_v46 = vadd.f32 %v1303_v23, %v1302_v21 }
 0x16a   : > { %v930_v37 = vpop.f32.mrf.mxu1 }
 0x16b   : > { %v926_v60 = vadd.f32 %v2084_v19, %v1304_v46 }
 0x16c   : > { %v1419_v4 = vpop.f32.mrf.mxu1 }
 0x16e   : > { %v940_v30 = vpop.f32.mrf.mxu1 }
 0x170   : > { %v1305_v54 = vpop.f32.mrf.mxu0 }
 0x172   : > { %v1306_v61 = vpop.f32.mrf.mxu0 }
 0x173   : > { %v1307_v6 = vadd.f32 %v1306_v61, %v1305_v54 }
 0x174   : > { %v1308_v1 = vpop.f32.mrf.mxu0 }
 0x175   : > { %v931_v11 = vadd.f32 %v1307_v6, %v930_v37 }
 0x176   : > { %v1309_v29 = vpop.f32.mrf.mxu0 }
 0x177   : > { %v1310_v15 = vadd.f32 %v1309_v29, %v1308_v1 }
 0x178   : > { %v1311_v7 = vpop.f32.mrf.mxu0 }
 0x179   : > { %v936_v24 = vadd.f32 %v1416_v14, %v1310_v15 }
 0x17a   : > { %v1312_v0 = vpop.f32.mrf.mxu0  ;;  %v2086_v10 = vpop.f32.mrf.mxu1 }
 0x17b   : > { %v1313_v28 = vadd.f32 %v1312_v0, %v1311_v7 }
 0x17c   : > { %v950_v3 = vpop.f32.mrf.mxu1 }
 0x17d   : > { %v941_v40 = vadd.f32 %v1313_v28, %v940_v30 }
 0x17e   : > { %v1314_v2 = vpop.f32.mrf.mxu0 }
 0x180   : > { %v1315_v5 = vpop.f32.mrf.mxu0 }
 0x181   : > { %v1316_v41 = vadd.f32 %v1315_v5, %v1314_v2 }
 0x182   : > { %v1377_v8 = vpop.f32.mrf.mxu1 }
 0x183   : > { %v946_v55 = vadd.f32 %v1419_v4, %v1316_v41 }
 0x184   : > { %v1317_v9 = vpop.f32.mrf.mxu0  ;;  %v1378_v48 = vpop.f32.mrf.mxu1 }
 0x185   : > { %v1379_v16 = vadd.f32 %v1378_v48, %v1377_v8 }
 0x186   : > { %v1318_v17 = vpop.f32.mrf.mxu0  ;;  %v1380_v22 = vpop.f32.mrf.mxu1 }
 0x187   : > { %v1036_v25 = vadd.f32 %v1379_v16, %v931_v11  ;;  %v1319_v56 = vadd.f32 %v1318_v17, %v1317_v9 }
 0x188   : > { %v1320_v26 = vpop.f32.mrf.mxu0  ;;  %v1381_v27 = vpop.f32.mrf.mxu1 }
 0x189   : > { %v1073_v31 = vadd.f32 %v2094_v18, %v1036_v25  ;;  %v1382_v32 = vadd.f32 %v1381_v27, %v1380_v22  ;;  %v951_v23 = vadd.f32 %v1319_v56, %v950_v3 }
 0x18a   : > { %v1321_v33 = vpop.f32.mrf.mxu0  ;;  %v1383_v35 = vpop.f32.mrf.mxu1 }
 0x18b   : > { %1081 = vst.msk [vmem:[%s2097_s9 + $0x10] sm:$0xff] %vm676_vm2, %v1073_v31  ;;  %v1041_v36 = vadd.f32 %v1382_v32, %v936_v24  ;;  %v1322_v14 = vadd.f32 %v1321_v33, %v1320_v26 }
 0x18c   : > { %v1371_v38 = vpop.f32.mrf.mxu0  ;;  %v1384_v39 = vpop.f32.mrf.mxu1 }
 0x18d   : > { %v1074_v42 = vadd.f32 %v2094_v18, %v1041_v36  ;;  %v1385_v43 = vadd.f32 %v1384_v39, %v1383_v35  ;;  %v956_v4 = vadd.f32 %v2086_v10, %v1322_v14 }
 0x18e   : > { %v1372_v44 = vpop.f32.mrf.mxu0  ;;  %v1386_v49 = vpop.f32.mrf.mxu1 }
 0x18f   : > { %v1373_v47 = vadd.f32 %v1372_v44, %v1371_v38  ;;  %1082 = vst.msk [vmem:[%s2097_s9 + $0x18] sm:$0xff] %vm676_vm2, %v1074_v42  ;;  %v1046_v50 = vadd.f32 %v1385_v43, %v941_v40 }
 0x190   : > { %v1374_v51 = vpop.f32.mrf.mxu0  ;;  %v1387_v53 = vpop.f32.mrf.mxu1 }
 0x191   : > { %v1026_v52 = vadd.f32 %v1373_v47, %v921_v45  ;;  %v1075_v57 = vadd.f32 %v2094_v18, %v1046_v50  ;;  %v1388_v58 = vadd.f32 %v1387_v53, %v1386_v49 }
 0x192   : > { %v1375_v59 = vpop.f32.mrf.mxu0  ;;  %v1389_v12 = vpop.f32.mrf.mxu1 }
 0x193   : > { %v1071_v62 = vadd.f32 %v2094_v18, %v1026_v52  ;;  %v1376_v63 = vadd.f32 %v1375_v59, %v1374_v51  ;;  %1083 = vst.msk [vmem:[%s2097_s9 + $0x20] sm:$0xff] %vm676_vm2, %v1075_v57  ;;  %v1051_v13 = vadd.f32 %v1388_v58, %v946_v55 }
 0x194   : > { %v1390_v20 = vpop.f32.mrf.mxu1 }
 0x195   : > { %1079 = vst.msk [vmem:[%s2097_s9] sm:$0xff] %vm676_vm2, %v1071_v62  ;;  %v1031_v21 = vadd.f32 %v1376_v63, %v926_v60  ;;  %v1076_v54 = vadd.f32 %v2094_v18, %v1051_v13  ;;  %v1391_v19 = vadd.f32 %v1390_v20, %v1389_v12 }
 0x196   : > { %v1392_v37 = vpop.f32.mrf.mxu1 }
 0x197   : > { %v1072_v61 = vadd.f32 %v2094_v18, %v1031_v21  ;;  %1084 = vst.msk [vmem:[%s2097_s9 + $0x28] sm:$0xff] %vm676_vm2, %v1076_v54  ;;  %v1056_v1 = vadd.f32 %v1391_v19, %v951_v23 }
 0x198   : > { %v1393_v29 = vpop.f32.mrf.mxu1 }
 0x199   : > { %1080 = vst.msk [vmem:[%s2097_s9 + $0x8] sm:$0xff] %vm676_vm2, %v1072_v61  ;;  %v1077_v7 = vadd.f32 %v2094_v18, %v1056_v1  ;;  %v1394_v30 = vadd.f32 %v1393_v29, %v1392_v37 }
 0x19b   : > { %1085 = vst.msk [vmem:[%s2097_s9 + $0x30] sm:$0xff] %vm676_vm2, %v1077_v7  ;;  %v1061_v0 = vadd.f32 %v1394_v30, %v956_v4 }
 0x19d   : > { %v1078_v10 = vadd.f32 %v2094_v18, %v1061_v0 }
 0x19f   : > { %1086 = vst.msk [vmem:[%s2097_s9 + $0x38] sm:$0xff] %vm676_vm2, %v1078_v10 }
 0x1a0   : > { %1567 = shalt.err (!%p1564_p5)
}
 0x1a1   : > { %s1568_s25 = scalar_lea.hbm %s2126_s13, 1024  ;;  %s1572_s5 = scalar_lea.hbm %s2184_s4, 2048 }
 0x1a2   : > { %p1569_p6 = scmp.ne.s32.totalorder %s2126_s13, %s1568_s25  ;;  %p1573_p10 = scmp.lt.s32.totalorder %s2126_s13, %s2184_s4 }
 0x1a3   : > { %p1574_p11 = scmp.lt.s32.totalorder %s1572_s5, %s1568_s25 }
 0x1a4   : > { %p1570_p7 = pnand %p1569_p6, %p1702_p4 }
 0x1a5   : > { %p1575_p12 = por %p1574_p11, %p1573_p10 }
 0x1a6   : > { %p1571_p9 = pneg %p1570_p7 }
 0x1a8   : > { %p1576_p13 = pnand %p1575_p12, %p1571_p9 }
 0x1aa   : > { %1579 = shalt.err (!%p1576_p13)
}
 0x1ab   : > { %s1635_s8 = smov 128   ;;  %s1636_s9 = smov 8  }
 0x1ac   : > { %1455 = dma.vmem_to_hbm [thread:$0]  (%p1702_p4), %s2128_s29, 1024, %s2126_s13, %s2135_s18, %s1635_s8, %s1635_s8, %s1636_s9  }
 0x1ad PF: > { %p1461_p0 = scmp.ge.s32.totalorder %s1630_s19, 2  ;;  %s1119_s10 = sand.u32 1, %s1610_s15  }
 0x1ae   : > { %s1120_s11 = scalar_lea.sflag [#allocation4], %s1119_s10 }
 0x1af   : > { %p1458_p1 = pnand %p1461_p0, %p1709_p8 }
 0x1b1   : > { %p1459_p2 = pneg %p1458_p1 }
 0x1b3   : > { %1605 = dma.done.wait (%p1459_p2), %s1120_s11, 1024  }
 0x1b4   : > { %1607 = vsyncadd (%p1459_p2), %s1120_s11, 4294966272  ;;  %s17_s19 = sadd.s32 1, %s1630_s19   ;;  %s2187_s15 = smov %s1614_s16 }
 0x1b5   : > { %p14_p3 = scmp.ge.s32.totalorder %s17_s19, 4   ;;  %s2188_s16 = smov %s1618_s17 }
 0x1b6   : > { %s2189_s17 = smov %s1715_s27  ;;  %s2190_s18 = smov %s1626_s1 }
 0x1b7   : > { %s2191_s1 = smov %s2193_s22  ;;  %16 = sbr.rel (!%p14_p3) target bundleno = 4 (0x4), region = 97 }
 0x1bc   :  { %1125 = vsyncpa [#allocation4], 1 }
 0x1bd   :  { %1127 = vsyncpa [#allocation4 + $0x1], 1 }

</bundles_post_ra>
